<compile_context>
chip_gen: v5e
topology: v5e:2x2
jax: 0.10.0
libtpu: 0.0.40
codegen_flags: <defaults>
</compile_context>

<pallas_src>
import jax
import jax.numpy as jnp
from jax.experimental import pallas as pl
from jax.experimental.pallas import tpu as pltpu

MATMUL_DTYPE = jnp.bfloat16  # MXU-native input dtype on v5e/v6e/v7x; accum stays f32.


# ---------------- fused Pallas kernel (one sample per grid step) ----------------

def _fused_forward_kernel(p_ref, wc_ref, bc_ref, w1_ref, b1_ref, o_ref):
    """conv3x3(+bias, ReLU) -> Linear -> Sigmoid for one sample.

    p_ref  : (9*Cin, H*W)       transposed im2col patches (bf16)
    wc_ref : (Cout, 9*Cin)      conv weight in im2col layout (bf16)
    bc_ref : (Cout, 1)          conv bias (f32)
    w1_ref : (Cout, H*W, out)   fc1 weight, NCHW-flatten order folded in (bf16)
    b1_ref : (1, out)           fc1 bias (f32)
    o_ref  : (1, 1, out)        sigmoid output for this sample (f32)
    """
    # Conv as one MXU matmul with lane-dense N = H*W (multiple of 128).
    conv = jnp.dot(wc_ref[...], p_ref[...], preferred_element_type=jnp.float32)
    conv = jnp.maximum(conv + bc_ref[...], 0.0)          # (Cout, H*W), f32, stays in VMEM
    act = conv.astype(w1_ref.dtype)

    # fc1: row-major flatten of `conv` is exactly torch's NCHW flatten, so
    # contract row-by-row against w1 reshaped to (Cout, H*W, out) -- no reshape
    # of the activation is needed.  Cout is small -> static unroll.
    cout = act.shape[0]
    z = b1_ref[...].astype(jnp.float32)                  # (1, out)
    for c in range(cout):
        z = z + jnp.dot(act[c:c + 1, :], w1_ref[c],
                        preferred_element_type=jnp.float32)
    o_ref[0] = jax.nn.sigmoid(z)


# ---------------- wrapper ----------------

def _prep_patches(x_nchw):
    """Transposed im2col for 3x3 SAME conv:
    (N, Cin, H, W) -> (N, 9*Cin, H*W), K index = (kh*3+kw)*Cin + ci, lane = h*W + w."""
    n, c, h, w = x_nchw.shape
    xp = jnp.pad(x_nchw, ((0, 0), (0, 0), (1, 1), (1, 1)))
    taps = [xp[:, :, kh:kh + h, kw:kw + w] for kh in range(3) for kw in range(3)]
    p = jnp.concatenate(taps, axis=1)                    # (N, 9*Cin, H, W)
    return p.reshape(n, 9 * c, h * w)


def _fused_apply(x_batch, params):
    """x_batch: (B, Cin, H, W) NCHW.  Returns (B, out_size) sigmoid outputs."""
    b, c, h, w = x_batch.shape
    cout = params["conv_w"].shape[0]
    out_size = params["fc_w"].shape[0]
    hw = h * w
    k = 9 * c

    patches = _prep_patches(x_batch).astype(MATMUL_DTYPE)                    # (B, 9Cin, HW)
    wc = params["conv_w"].transpose(0, 2, 3, 1).reshape(cout, k).astype(MATMUL_DTYPE)
    bc = params["conv_b"].reshape(cout, 1).astype(jnp.float32)
    # Fold torch's NCHW flatten order into the fc weight (zero-cost layout plumbing).
    w1r = params["fc_w"].T.reshape(cout, hw, out_size).astype(MATMUL_DTYPE)  # (Cout, HW, out)
    b1 = params["fc_b"].reshape(1, out_size).astype(jnp.float32)

    out = pl.pallas_call(
        _fused_forward_kernel,
        out_shape=jax.ShapeDtypeStruct((b, 1, out_size), jnp.float32),
        grid=(b,),
        in_specs=[
            pl.BlockSpec((None, k, hw), lambda i: (i, 0, 0)),          # per-sample patches
            pl.BlockSpec((cout, k), lambda i: (0, 0)),                 # conv weight (resident)
            pl.BlockSpec((cout, 1), lambda i: (0, 0)),                 # conv bias (resident)
            pl.BlockSpec((cout, hw, out_size), lambda i: (0, 0, 0)),   # fc weight (resident)
            pl.BlockSpec((1, out_size), lambda i: (0, 0)),             # fc bias (resident)
        ],
        out_specs=pl.BlockSpec((1, 1, out_size), lambda i: (i, 0, 0)),
        compiler_params=pltpu.CompilerParams(
            dimension_semantics=("parallel",),        # independent samples; 2 TCs on v7x
            vmem_limit_bytes=32 * 1024 * 1024,        # fits v7x/v6e/v5e scoped budgets
        ),
    )(patches, wc, bc, w1r, b1)
    return out.reshape(b, out_size)


def siamese_cnn_forward(x1, x2, params):
    # Shared weights: run both branches in ONE batched fused call, then split.
    n = x1.shape[0]
    xb = jnp.concatenate([x1, x2], axis=0)               # (2N, Cin, H, W)
    out = _fused_apply(xb, params)
    return out[:n], out[n:]


def init_params(key, cin, cout, h, w, out_size):
    # Torch-convention shapes: conv (Cout,Cin,3,3); Linear weight (out, flat_dim).
    flat_dim = cout * h * w
    ks = jax.random.split(key, 4)
    s = 0.05
    return {
        "conv_w": s * jax.random.normal(ks[0], (cout, cin, 3, 3), jnp.float32),
        "conv_b": s * jax.random.normal(ks[1], (cout,), jnp.float32),
        "fc_w":   s * jax.random.normal(ks[2], (out_size, flat_dim), jnp.float32),
        "fc_b":   s * jax.random.normal(ks[3], (out_size,), jnp.float32),
    }


# ---------------- pure-JAX/XLA reference (f32) ----------------

def _reference_forward_once(x, params):
    y = jax.lax.conv_general_dilated(
        x, params["conv_w"], window_strides=(1, 1), padding="SAME",
        dimension_numbers=("NCHW", "OIHW", "NCHW"))
    y = jax.nn.relu(y + params["conv_b"][None, :, None, None])
    flat = y.reshape(y.shape[0], -1)                      # NCHW flatten (torch view order)
    z = flat @ params["fc_w"].T + params["fc_b"]
    return jax.nn.sigmoid(z)


if __name__ == "__main__":
    N, C, H, W = 2, 4, 16, 16
    COUT, OUT_SIZE = 8, 8                                 # flat_dim = 8*16*16 = 2048

    key = jax.random.PRNGKey(0)
    k1, k2, kp = jax.random.split(key, 3)
    x1 = jax.random.normal(k1, (N, C, H, W), jnp.float32)
    x2 = jax.random.normal(k2, (N, C, H, W), jnp.float32)
    params = init_params(kp, C, COUT, H, W, OUT_SIZE)

    fwd = jax.jit(siamese_cnn_forward)
    out1, out2 = jax.block_until_ready(fwd(x1, x2, params))

    ref1 = _reference_forward_once(x1, params)
    ref2 = _reference_forward_once(x2, params)
    assert out1.shape == (N, OUT_SIZE) and out2.shape == (N, OUT_SIZE)
    # bf16 MXU inputs (f32 accumulation) -> slightly looser tolerance than pure f32.
    assert jnp.allclose(out1, ref1, atol=1e-2, rtol=1e-2), float(jnp.max(jnp.abs(out1 - ref1)))
    assert jnp.allclose(out2, ref2, atol=1e-2, rtol=1e-2), float(jnp.max(jnp.abs(out2 - ref2)))

    print("KERNEL_OK")
</pallas_src>

<mosaic_0001>
module attributes {stable_mosaic.version = 11 : i64} {
  func.func @_fused_forward_kernel(%arg0: i32, %arg1: memref<1x36x256xbf16, #tpu.memory_space<vmem>>, %arg2: memref<8x36xbf16, #tpu.memory_space<vmem>>, %arg3: memref<8x1xf32, #tpu.memory_space<vmem>>, %arg4: memref<8x256x8xbf16, #tpu.memory_space<vmem>>, %arg5: memref<1x8xf32, #tpu.memory_space<vmem>>, %arg6: memref<1x1x8xf32, #tpu.memory_space<vmem>>) attributes {dimension_semantics = [#tpu.dimension_semantics<parallel>], iteration_bounds = array<i64: 4>, scalar_prefetch = 0 : i64, scratch_operands = 0 : i64, tpu.core_type = #tpu.core_type<tc>, window_params = [{transform_indices = @transform_0, window_bounds = array<i64: 1, 36, 256>}, {pipeline_mode = #tpu.pipeline_mode<synchronous>, transform_indices = @transform_1, window_bounds = array<i64: 8, 36>}, {pipeline_mode = #tpu.pipeline_mode<synchronous>, transform_indices = @transform_2, window_bounds = array<i64: 8, 1>}, {pipeline_mode = #tpu.pipeline_mode<synchronous>, transform_indices = @transform_3, window_bounds = array<i64: 8, 256, 8>}, {pipeline_mode = #tpu.pipeline_mode<synchronous>, transform_indices = @transform_4, window_bounds = array<i64: 1, 8>}, {transform_indices = @transform_5, window_bounds = array<i64: 1, 1, 8>}]} {
    %c0 = arith.constant 0 : index
    %c0_0 = arith.constant 0 : index
    %0 = vector.load %arg2[%c0, %c0_0] : memref<8x36xbf16, #tpu.memory_space<vmem>>, vector<8x36xbf16>
    %c0_1 = arith.constant 0 : index
    %c0_2 = arith.constant 0 : index
    %c0_3 = arith.constant 0 : index
    %1 = vector.load %arg1[%c0_1, %c0_2, %c0_3] : memref<1x36x256xbf16, #tpu.memory_space<vmem>>, vector<1x36x256xbf16>
    %2 = vector.shape_cast %1 : vector<1x36x256xbf16> to vector<36x256xbf16>
    %cst = arith.constant dense<0.000000e+00> : vector<8x256xf32>
    %3 = tpu.matmul %0, %2, %cst {dimension_numbers = #tpu.dot_dimension_numbers<[1], [0], [0], [1], [0, 0, 1, 1], [], []>} : vector<8x36xbf16>, vector<36x256xbf16>, vector<8x256xf32> -> vector<8x256xf32>
    %c0_4 = arith.constant 0 : index
    %c0_5 = arith.constant 0 : index
    %4 = vector.load %arg3[%c0_4, %c0_5] : memref<8x1xf32, #tpu.memory_space<vmem>>, vector<8x1xf32>
    %5 = vector.broadcast %4 : vector<8x1xf32> to vector<8x256xf32>
    %6 = arith.addf %3, %5 : vector<8x256xf32>
    %cst_6 = arith.constant 0.000000e+00 : f32
    %7 = vector.broadcast %cst_6 : f32 to vector<8x256xf32>
    %8 = arith.maximumf %6, %7 : vector<8x256xf32>
    %9 = arith.truncf %8 : vector<8x256xf32> to vector<8x256xbf16>
    %c0_7 = arith.constant 0 : index
    %c0_8 = arith.constant 0 : index
    %10 = vector.load %arg5[%c0_7, %c0_8] : memref<1x8xf32, #tpu.memory_space<vmem>>, vector<1x8xf32>
    %11 = vector.extract_strided_slice %9 {offsets = [0, 0], sizes = [1, 256], strides = [1, 1]} : vector<8x256xbf16> to vector<1x256xbf16>
    %c0_9 = arith.constant 0 : index
    %c0_10 = arith.constant 0 : index
    %c0_11 = arith.constant 0 : index
    %12 = vector.load %arg4[%c0_9, %c0_10, %c0_11] : memref<8x256x8xbf16, #tpu.memory_space<vmem>>, vector<1x256x8xbf16>
    %13 = vector.shape_cast %12 : vector<1x256x8xbf16> to vector<256x8xbf16>
    %cst_12 = arith.constant dense<0.000000e+00> : vector<1x8xf32>
    %14 = tpu.matmul %11, %13, %cst_12 {dimension_numbers = #tpu.dot_dimension_numbers<[1], [0], [0], [1], [0, 0, 1, 1], [], []>} : vector<1x256xbf16>, vector<256x8xbf16>, vector<1x8xf32> -> vector<1x8xf32>
    %15 = arith.addf %10, %14 : vector<1x8xf32>
    %16 = vector.extract_strided_slice %9 {offsets = [1, 0], sizes = [1, 256], strides = [1, 1]} : vector<8x256xbf16> to vector<1x256xbf16>
    %c1 = arith.constant 1 : index
    %c0_13 = arith.constant 0 : index
    %c0_14 = arith.constant 0 : index
    %17 = vector.load %arg4[%c1, %c0_13, %c0_14] : memref<8x256x8xbf16, #tpu.memory_space<vmem>>, vector<1x256x8xbf16>
    %18 = vector.shape_cast %17 : vector<1x256x8xbf16> to vector<256x8xbf16>
    %cst_15 = arith.constant dense<0.000000e+00> : vector<1x8xf32>
    %19 = tpu.matmul %16, %18, %cst_15 {dimension_numbers = #tpu.dot_dimension_numbers<[1], [0], [0], [1], [0, 0, 1, 1], [], []>} : vector<1x256xbf16>, vector<256x8xbf16>, vector<1x8xf32> -> vector<1x8xf32>
    %20 = arith.addf %15, %19 : vector<1x8xf32>
    %21 = vector.extract_strided_slice %9 {offsets = [2, 0], sizes = [1, 256], strides = [1, 1]} : vector<8x256xbf16> to vector<1x256xbf16>
    %c2 = arith.constant 2 : index
    %c0_16 = arith.constant 0 : index
    %c0_17 = arith.constant 0 : index
    %22 = vector.load %arg4[%c2, %c0_16, %c0_17] : memref<8x256x8xbf16, #tpu.memory_space<vmem>>, vector<1x256x8xbf16>
    %23 = vector.shape_cast %22 : vector<1x256x8xbf16> to vector<256x8xbf16>
    %cst_18 = arith.constant dense<0.000000e+00> : vector<1x8xf32>
    %24 = tpu.matmul %21, %23, %cst_18 {dimension_numbers = #tpu.dot_dimension_numbers<[1], [0], [0], [1], [0, 0, 1, 1], [], []>} : vector<1x256xbf16>, vector<256x8xbf16>, vector<1x8xf32> -> vector<1x8xf32>
    %25 = arith.addf %20, %24 : vector<1x8xf32>
    %26 = vector.extract_strided_slice %9 {offsets = [3, 0], sizes = [1, 256], strides = [1, 1]} : vector<8x256xbf16> to vector<1x256xbf16>
    %c3 = arith.constant 3 : index
    %c0_19 = arith.constant 0 : index
    %c0_20 = arith.constant 0 : index
    %27 = vector.load %arg4[%c3, %c0_19, %c0_20] : memref<8x256x8xbf16, #tpu.memory_space<vmem>>, vector<1x256x8xbf16>
    %28 = vector.shape_cast %27 : vector<1x256x8xbf16> to vector<256x8xbf16>
    %cst_21 = arith.constant dense<0.000000e+00> : vector<1x8xf32>
    %29 = tpu.matmul %26, %28, %cst_21 {dimension_numbers = #tpu.dot_dimension_numbers<[1], [0], [0], [1], [0, 0, 1, 1], [], []>} : vector<1x256xbf16>, vector<256x8xbf16>, vector<1x8xf32> -> vector<1x8xf32>
    %30 = arith.addf %25, %29 : vector<1x8xf32>
    %31 = vector.extract_strided_slice %9 {offsets = [4, 0], sizes = [1, 256], strides = [1, 1]} : vector<8x256xbf16> to vector<1x256xbf16>
    %c4 = arith.constant 4 : index
    %c0_22 = arith.constant 0 : index
    %c0_23 = arith.constant 0 : index
    %32 = vector.load %arg4[%c4, %c0_22, %c0_23] : memref<8x256x8xbf16, #tpu.memory_space<vmem>>, vector<1x256x8xbf16>
    %33 = vector.shape_cast %32 : vector<1x256x8xbf16> to vector<256x8xbf16>
    %cst_24 = arith.constant dense<0.000000e+00> : vector<1x8xf32>
    %34 = tpu.matmul %31, %33, %cst_24 {dimension_numbers = #tpu.dot_dimension_numbers<[1], [0], [0], [1], [0, 0, 1, 1], [], []>} : vector<1x256xbf16>, vector<256x8xbf16>, vector<1x8xf32> -> vector<1x8xf32>
    %35 = arith.addf %30, %34 : vector<1x8xf32>
    %36 = vector.extract_strided_slice %9 {offsets = [5, 0], sizes = [1, 256], strides = [1, 1]} : vector<8x256xbf16> to vector<1x256xbf16>
    %c5 = arith.constant 5 : index
    %c0_25 = arith.constant 0 : index
    %c0_26 = arith.constant 0 : index
    %37 = vector.load %arg4[%c5, %c0_25, %c0_26] : memref<8x256x8xbf16, #tpu.memory_space<vmem>>, vector<1x256x8xbf16>
    %38 = vector.shape_cast %37 : vector<1x256x8xbf16> to vector<256x8xbf16>
    %cst_27 = arith.constant dense<0.000000e+00> : vector<1x8xf32>
    %39 = tpu.matmul %36, %38, %cst_27 {dimension_numbers = #tpu.dot_dimension_numbers<[1], [0], [0], [1], [0, 0, 1, 1], [], []>} : vector<1x256xbf16>, vector<256x8xbf16>, vector<1x8xf32> -> vector<1x8xf32>
    %40 = arith.addf %35, %39 : vector<1x8xf32>
    %41 = vector.extract_strided_slice %9 {offsets = [6, 0], sizes = [1, 256], strides = [1, 1]} : vector<8x256xbf16> to vector<1x256xbf16>
    %c6 = arith.constant 6 : index
    %c0_28 = arith.constant 0 : index
    %c0_29 = arith.constant 0 : index
    %42 = vector.load %arg4[%c6, %c0_28, %c0_29] : memref<8x256x8xbf16, #tpu.memory_space<vmem>>, vector<1x256x8xbf16>
    %43 = vector.shape_cast %42 : vector<1x256x8xbf16> to vector<256x8xbf16>
    %cst_30 = arith.constant dense<0.000000e+00> : vector<1x8xf32>
    %44 = tpu.matmul %41, %43, %cst_30 {dimension_numbers = #tpu.dot_dimension_numbers<[1], [0], [0], [1], [0, 0, 1, 1], [], []>} : vector<1x256xbf16>, vector<256x8xbf16>, vector<1x8xf32> -> vector<1x8xf32>
    %45 = arith.addf %40, %44 : vector<1x8xf32>
    %46 = vector.extract_strided_slice %9 {offsets = [7, 0], sizes = [1, 256], strides = [1, 1]} : vector<8x256xbf16> to vector<1x256xbf16>
    %c7 = arith.constant 7 : index
    %c0_31 = arith.constant 0 : index
    %c0_32 = arith.constant 0 : index
    %47 = vector.load %arg4[%c7, %c0_31, %c0_32] : memref<8x256x8xbf16, #tpu.memory_space<vmem>>, vector<1x256x8xbf16>
    %48 = vector.shape_cast %47 : vector<1x256x8xbf16> to vector<256x8xbf16>
    %cst_33 = arith.constant dense<0.000000e+00> : vector<1x8xf32>
    %49 = tpu.matmul %46, %48, %cst_33 {dimension_numbers = #tpu.dot_dimension_numbers<[1], [0], [0], [1], [0, 0, 1, 1], [], []>} : vector<1x256xbf16>, vector<256x8xbf16>, vector<1x8xf32> -> vector<1x8xf32>
    %50 = arith.addf %45, %49 : vector<1x8xf32>
    %51 = arith.negf %50 : vector<1x8xf32>
    %52 = math.exp %51 : vector<1x8xf32>
    %cst_34 = arith.constant 1.000000e+00 : f32
    %53 = vector.broadcast %cst_34 : f32 to vector<1x8xf32>
    %54 = arith.addf %53, %52 : vector<1x8xf32>
    %55 = arith.divf %53, %54 : vector<1x8xf32>
    %c0_35 = arith.constant 0 : index
    %c0_36 = arith.constant 0 : index
    %c0_37 = arith.constant 0 : index
    %56 = vector.load %arg6[%c0_35, %c0_36, %c0_37] : memref<1x1x8xf32, #tpu.memory_space<vmem>>, vector<1x1x8xf32>
    %57 = vector.shape_cast %56 : vector<1x1x8xf32> to vector<1x8xf32>
    %58 = vector.shape_cast %55 : vector<1x8xf32> to vector<1x1x8xf32>
    tpu.vector_store %arg6[%c0_35, %c0_36, %c0_37], %58 {strides = array<i32>} : memref<1x1x8xf32, #tpu.memory_space<vmem>>, vector<1x1x8xf32>,
    return
  }
  func.func @transform_0(%arg0: i32) -> (i32, i32, i32) {
    %c0_i32 = arith.constant 0 : i32
    %c0_i32_0 = arith.constant 0 : i32
    %c0_i32_1 = arith.constant 0 : i32
    return %arg0, %c0_i32, %c0_i32_0 : i32, i32, i32
  }
  func.func @transform_1(%arg0: i32) -> (i32, i32) {
    %c0_i32 = arith.constant 0 : i32
    %c0_i32_0 = arith.constant 0 : i32
    %c0_i32_1 = arith.constant 0 : i32
    return %c0_i32, %c0_i32_0 : i32, i32
  }
  func.func @transform_2(%arg0: i32) -> (i32, i32) {
    %c0_i32 = arith.constant 0 : i32
    %c0_i32_0 = arith.constant 0 : i32
    %c0_i32_1 = arith.constant 0 : i32
    return %c0_i32, %c0_i32_0 : i32, i32
  }
  func.func @transform_3(%arg0: i32) -> (i32, i32, i32) {
    %c0_i32 = arith.constant 0 : i32
    %c0_i32_0 = arith.constant 0 : i32
    %c0_i32_1 = arith.constant 0 : i32
    %c0_i32_2 = arith.constant 0 : i32
    return %c0_i32, %c0_i32_0, %c0_i32_1 : i32, i32, i32
  }
  func.func @transform_4(%arg0: i32) -> (i32, i32) {
    %c0_i32 = arith.constant 0 : i32
    %c0_i32_0 = arith.constant 0 : i32
    %c0_i32_1 = arith.constant 0 : i32
    return %c0_i32, %c0_i32_0 : i32, i32
  }
  func.func @transform_5(%arg0: i32) -> (i32, i32, i32) {
    %c0_i32 = arith.constant 0 : i32
    %c0_i32_0 = arith.constant 0 : i32
    %c0_i32_1 = arith.constant 0 : i32
    return %arg0, %c0_i32, %c0_i32_0 : i32, i32, i32
  }
}

</mosaic_0001>

<bundles_post_ra>
// kernel: siamese_cnn_forward.1
= control target key start
LH: loop header
LB: loop body
LE: loop exit
PB: predicated region body
PF: predicated region fallthrough
CT: control target
= control target key end

     0   :  { %s2603_s18 = smov 0   ;;  %s3043_s0 = inlined_call_operand.vmem [shape: bf16[4,36,256], index: 0, kind: input, shape index: {}]   ;;  %s3044_s1 = inlined_call_operand.vmem [shape: bf16[8,36], index: 1, kind: input, shape index: {}]   ;;  %s3045_s2 = inlined_call_operand.vmem [shape: f32[8,1], index: 2, kind: input, shape index: {}]   ;;  %s3046_s3 = inlined_call_operand.vmem [shape: bf16[8,256,8], index: 3, kind: input, shape index: {}]   ;;  %s3047_s4 = inlined_call_operand.vmem [shape: f32[1,8], index: 4, kind: input, shape index: {}]   ;;  %s3048_s5 = inlined_call_operand.vmem [shape: f32[4,1,8], index: 5, kind: output, shape index: {}]  }
   0x1 LB: > { %s1654_s19 = sadd.s32 4294967295, %s2570_s18   ;;  %p1658_p0 = scmp.ge.s32.totalorder %s2570_s18, 1  ;;  %s2570_s18 = sphi %s2603_s18, %s15_s18  }
   0x2   : > { %p187_p1 = scmp.lt.s32.totalorder %s2570_s18, 5 }
   0x4   : > { %p188_p2 = pnand %p1658_p0, %p187_p1 }
   0x5   : > { %p213_p3 = scmp.lt.s32.totalorder (!%p188_p2), %s1654_s19, 3 }
   0x6   : > { %191 = sbr.rel (%p188_p2) target bundleno = 402 (0x192), region = 40 }
   0xb   : > { %v2572_v0 = vmov 0   ;;  %v228_v1 = vld [vmem:[%s3045_s2] sm:$0xff]  ;;  %v2428_v2 = vld [vmem:[%s3046_s3 + $0x38] sm:$0xff]  ;;  %s3050_s19 = smov (!%p213_p3, %s1654_s19), 3  ;;  %v2427_v4 = vld [vmem:[%s3046_s3 + $0x30] sm:$0xff]  ;;  %vm263_vm0 = vcmask 1041408  }
   0xc   : > { %2559 = vset.pattern.permute.xlu0 %v2572_v0  ;;  %v2436_v3 = vld [vmem:[%s3046_s3 + $0x78] sm:$0xff]  ;;  %435 = vmatpush.bf16.msra.mxu2 %v2428_v2  ;;  %v2435_v5 = vld [vmem:[%s3046_s3 + $0x70] sm:$0xff]  ;;  %s2549_s30 = smul.u32 40, %s3050_s19  ;;  %v2426_v7 = vld [vmem:[%s3046_s3 + $0x28] sm:$0xff]  ;;  %vm259_vm1 = vcmask 293888   ;;  %s220_s10 = scalar_lea.vmem %s3048_s5, %s3050_s19  ;;  %vm1605_vm5 = vcmask 57344  }
   0xd   : > { %231 = vperm.xlu0 %2559, %v228_v1   ;;  %448 = vmatpush.bf16.msra.mxu3 %v2436_v3  ;;  %v2434_v8 = vld [vmem:[%s3046_s3 + $0x68] sm:$0xff]  ;;  %v2425_v17 = vld [vmem:[%s3046_s3 + $0x20] sm:$0xff]  ;;  %v2424_v27 = vld [vmem:[%s3046_s3 + $0x18] sm:$0xff] }
   0xe   : > { %s217_s8 = scalar_lea.vmem %s3043_s0, %s2549_s30  ;;  %v2433_v18 = vld [vmem:[%s3046_s3 + $0x60] sm:$0xff]  ;;  %v2432_v28 = vld [vmem:[%s3046_s3 + $0x58] sm:$0xff]  ;;  %v2423_v33 = vld [vmem:[%s3046_s3 + $0x10] sm:$0xff] }
   0xf   : > { %v227_v6 = vld [vmem:[%s217_s8 + $0x20] sm:$0x33]  ;;  %v1670_v11 = vld [vmem:[%s217_s8 + $0x10] sm:$0xf]  ;;  %v2420_v14 = vld [vmem:[%s217_s8 + $0x14] sm:$0xf0] }
  0x10   : > { %436 = vmatpush.bf16.msra.mxu2 %v2427_v4  ;;  %v247_v9 = vunpack.c.l.b16 %v227_v6  ;;  %v248_v10 = vunpack.c.h.b16 %v227_v6  ;;  %v2419_v15 = vld [vmem:[%s217_s8 + $0x14] sm:$0xf]  ;;  %v1672_v16 = vld [vmem:[%s217_s8 + $0x18] sm:$0xf0]  ;;  %v1671_v21 = vor.u32 %v2420_v14, %v1670_v11  ;;  %v1662_v23 = vld [vmem:[%s217_s8] sm:$0xf] }
  0x11   : > { %449 = vmatpush.bf16.msra.mxu3 %v2435_v5  ;;  %v1675_v22 = vor.u32 %v2419_v15, %v1672_v16  ;;  %v2418_v24 = vld [vmem:[%s217_s8 + $0x4] sm:$0xf0]  ;;  %v2417_v25 = vld [vmem:[%s217_s8 + $0x4] sm:$0xf]  ;;  %v1664_v26 = vld [vmem:[%s217_s8 + $0x8] sm:$0xf0] }
  0x12   : > { %v253_v12 = vpack.c.b16 %v247_v9, %v247_v9  ;;  %v254_v13 = vpack.c.b16 %v248_v10, %v248_v10  ;;  %v1663_v29 = vor.u32 %v2418_v24, %v1662_v23  ;;  %v1667_v30 = vor.u32 %v2417_v25, %v1664_v26  ;;  %v2444_v31 = vld [vmem:[%s3046_s3 + $0xb8] sm:$0xff]  ;;  %v2431_v34 = vld [vmem:[%s3046_s3 + $0x50] sm:$0xff]  ;;  %v222_v35 = vld [vmem:[%s3044_s1] sm:$0xf] }
  0x13   : > { %v2452_v32 = vld [vmem:[%s3046_s3 + $0xf8] sm:$0xff]  ;;  %v2443_v36 = vld [vmem:[%s3046_s3 + $0xb0] sm:$0xff]  ;;  %v2422_v38 = vld [vmem:[%s3046_s3 + $0x8] sm:$0xff] }
  0x14   : > { %437 = vmatpush.bf16.msra.mxu2 %v2426_v7  ;;  %v265_v19 = vsel %vm263_vm0, %v253_v12, 0  ;;  %v268_v20 = vsel %vm263_vm0, %v254_v13, 0  ;;  %v2451_v37 = vld [vmem:[%s3046_s3 + $0xf0] sm:$0xff]  ;;  %v2430_v39 = vld [vmem:[%s3046_s3 + $0x48] sm:$0xff]  ;;  %v2421_v42 = vld [vmem:[%s3046_s3] sm:$0xff] }
  0x15   : > { %450 = vmatpush.bf16.msra.mxu3 %v2434_v8  ;;  %275 = vmatpush.bf16.msra.mxu0 %v265_v19  ;;  %v2442_v40 = vld [vmem:[%s3046_s3 + $0xa8] sm:$0xff]  ;;  %v2429_v43 = vld [vmem:[%s3046_s3 + $0x40] sm:$0xff]  ;;  %v2460_v44 = vld [vmem:[%s3046_s3 + $0x138] sm:$0xff] }
  0x16   : > { %288 = vmatpush.bf16.msra.mxu1 %v268_v20  ;;  %v2450_v41 = vld [vmem:[%s3046_s3 + $0xe8] sm:$0xff]  ;;  %v2468_v45 = vld [vmem:[%s3046_s3 + $0x178] sm:$0xff]  ;;  %v2441_v46 = vld [vmem:[%s3046_s3 + $0xa0] sm:$0xff] }
  0x17   : > { %v2449_v47 = vld [vmem:[%s3046_s3 + $0xe0] sm:$0xff]  ;;  %v2459_v48 = vld [vmem:[%s3046_s3 + $0x130] sm:$0xff]  ;;  %v2440_v50 = vld [vmem:[%s3046_s3 + $0x98] sm:$0xff] }
  0x18   : > { %438 = vmatpush.bf16.msra.mxu2 %v2425_v17  ;;  %v2467_v49 = vld [vmem:[%s3046_s3 + $0x170] sm:$0xff]  ;;  %v2448_v51 = vld [vmem:[%s3046_s3 + $0xd8] sm:$0xff]  ;;  %v2458_v52 = vld [vmem:[%s3046_s3 + $0x128] sm:$0xff] }
  0x19   : > { %451 = vmatpush.bf16.msra.mxu3 %v2433_v18  ;;  %276 = vmatpush.bf16.msra.mxu0 %v1671_v21  ;;  %v2466_v53 = vld [vmem:[%s3046_s3 + $0x168] sm:$0xff]  ;;  %v2439_v54 = vld [vmem:[%s3046_s3 + $0x90] sm:$0xff]  ;;  %v2457_v56 = vld [vmem:[%s3046_s3 + $0x120] sm:$0xff] }
  0x1a   : > { %289 = vmatpush.bf16.msra.mxu1 %v1675_v22  ;;  %v2447_v55 = vld [vmem:[%s3046_s3 + $0xd0] sm:$0xff]  ;;  %v2465_v57 = vld [vmem:[%s3046_s3 + $0x160] sm:$0xff]  ;;  %v2438_v58 = vld [vmem:[%s3046_s3 + $0x88] sm:$0xff] }
  0x1b   : > { %v2446_v59 = vld [vmem:[%s3046_s3 + $0xc8] sm:$0xff]  ;;  %v2456_v60 = vld [vmem:[%s3046_s3 + $0x118] sm:$0xff]  ;;  %v2437_v62 = vld [vmem:[%s3046_s3 + $0x80] sm:$0xff] }
  0x1c   : > { %439 = vmatpush.bf16.msra.mxu2 %v2424_v27  ;;  %v2464_v61 = vld [vmem:[%s3046_s3 + $0x158] sm:$0xff]  ;;  %v2445_v63 = vld [vmem:[%s3046_s3 + $0xc0] sm:$0xff]  ;;  %v2475_v2 = vld [vmem:[%s3046_s3 + $0x1b0] sm:$0xff] }
  0x1d   : > { %452 = vmatpush.bf16.msra.mxu3 %v2432_v28  ;;  %277 = vmatpush.bf16.msra.mxu0 %v1663_v29  ;;  %v2476_v0 = vld [vmem:[%s3046_s3 + $0x1b8] sm:$0xff]  ;;  %v2483_v3 = vld [vmem:[%s3046_s3 + $0x1f0] sm:$0xff]  ;;  %v2474_v4 = vld [vmem:[%s3046_s3 + $0x1a8] sm:$0xff] }
  0x1e   : > { %290 = vmatpush.bf16.msra.mxu1 %v1667_v30  ;;  %v2484_v1 = vld [vmem:[%s3046_s3 + $0x1f8] sm:$0xff]  ;;  %v2482_v5 = vld [vmem:[%s3046_s3 + $0x1e8] sm:$0xff]  ;;  %v2473_v6 = vld [vmem:[%s3046_s3 + $0x1a0] sm:$0xff] }
  0x1f   : > { %v2481_v7 = vld [vmem:[%s3046_s3 + $0x1e0] sm:$0xff]  ;;  %v2472_v8 = vld [vmem:[%s3046_s3 + $0x198] sm:$0xff]  ;;  %v2455_v10 = vld [vmem:[%s3046_s3 + $0x110] sm:$0xff] }
  0x20   : > { %440 = vmatpush.bf16.msra.mxu2 %v2423_v33  ;;  %1676 = vmatmul.msk.bf16.vlgmr.msra.gmra.mxu0 %vm259_vm1, %v222_v35  ;;  %v2480_v9 = vld [vmem:[%s3046_s3 + $0x1d8] sm:$0xff]  ;;  %v2463_v11 = vld [vmem:[%s3046_s3 + $0x150] sm:$0xff]  ;;  %v2454_v14 = vld [vmem:[%s3046_s3 + $0x108] sm:$0xff] }
  0x21   : > { %599 = vmatpush.bf16.msrb.mxu0 %v2444_v31  ;;  %453 = vmatpush.bf16.msra.mxu3 %v2431_v34  ;;  %v2471_v12 = vld [vmem:[%s3046_s3 + $0x190] sm:$0xff]  ;;  %v2462_v15 = vld [vmem:[%s3046_s3 + $0x148] sm:$0xff]  ;;  %v2453_v18 = vld [vmem:[%s3046_s3 + $0x100] sm:$0xff] }
  0x22   : > { %612 = vmatpush.bf16.msrb.mxu1 %v2452_v32  ;;  %v2479_v13 = vld [vmem:[%s3046_s3 + $0x1d0] sm:$0xff]  ;;  %v2470_v16 = vld [vmem:[%s3046_s3 + $0x188] sm:$0xff]  ;;  %v2461_v19 = vld [vmem:[%s3046_s3 + $0x140] sm:$0xff] }
  0x23   : > { %1677 = vmatmul.msk.bf16.vlgmr.msra.gmra.mxu1 %vm259_vm1, %v222_v35  ;;  %v2478_v17 = vld [vmem:[%s3046_s3 + $0x1c8] sm:$0xff]  ;;  %v2469_v20 = vld [vmem:[%s3046_s3 + $0x180] sm:$0xff]  ;;  %v2492_v34 = vld [vmem:[%s3046_s3 + $0x238] sm:$0xff] }
  0x24   : > { %441 = vmatpush.bf16.msra.mxu2 %v2422_v38  ;;  %v2477_v21 = vld [vmem:[%s3046_s3 + $0x1c0] sm:$0xff]  ;;  %v2500_v35 = vld [vmem:[%s3046_s3 + $0x278] sm:$0xff] }
  0x25   : > { %600 = vmatpush.bf16.msrb.mxu0 %v2443_v36  ;;  %454 = vmatpush.bf16.msra.mxu3 %v2430_v39  ;;  %v2508_v38 = vld [vmem:[%s3046_s3 + $0x2b8] sm:$0xff] }
  0x26   : > { %613 = vmatpush.bf16.msrb.mxu1 %v2451_v37  ;;  %v2516_v39 = vld [vmem:[%s3046_s3 + $0x2f8] sm:$0xff] }
  0x28   : > { %442 = vmatpush.bf16.msra.mxu2 %v2421_v42  ;;  %v2491_v42 = vld [vmem:[%s3046_s3 + $0x230] sm:$0xff] }
  0x29   : > { %601 = vmatpush.bf16.msrb.mxu0 %v2442_v40  ;;  %455 = vmatpush.bf16.msra.mxu3 %v2429_v43  ;;  %v2499_v43 = vld [vmem:[%s3046_s3 + $0x270] sm:$0xff] }
  0x2a   : > { %614 = vmatpush.bf16.msrb.mxu1 %v2450_v41 }
  0x2c   : > { %759 = vmatpush.bf16.msrb.mxu2 %v2460_v44  ;;  %v2507_v44 = vld [vmem:[%s3046_s3 + $0x2b0] sm:$0xff] }
  0x2d   : > { %772 = vmatpush.bf16.msrb.mxu3 %v2468_v45  ;;  %602 = vmatpush.bf16.msrb.mxu0 %v2441_v46  ;;  %v2515_v45 = vld [vmem:[%s3046_s3 + $0x2f0] sm:$0xff]  ;;  %v2490_v46 = vld [vmem:[%s3046_s3 + $0x228] sm:$0xff] }
  0x2e   : > { %615 = vmatpush.bf16.msrb.mxu1 %v2449_v47  ;;  %v2498_v47 = vld [vmem:[%s3046_s3 + $0x268] sm:$0xff] }
  0x30   : > { %760 = vmatpush.bf16.msrb.mxu2 %v2459_v48  ;;  %v2506_v48 = vld [vmem:[%s3046_s3 + $0x2a8] sm:$0xff] }
  0x31   : > { %773 = vmatpush.bf16.msrb.mxu3 %v2467_v49  ;;  %603 = vmatpush.bf16.msrb.mxu0 %v2440_v50  ;;  %v2514_v49 = vld [vmem:[%s3046_s3 + $0x2e8] sm:$0xff]  ;;  %v2489_v50 = vld [vmem:[%s3046_s3 + $0x220] sm:$0xff] }
  0x32   : > { %616 = vmatpush.bf16.msrb.mxu1 %v2448_v51  ;;  %v2497_v51 = vld [vmem:[%s3046_s3 + $0x260] sm:$0xff] }
  0x34   : > { %761 = vmatpush.bf16.msrb.mxu2 %v2458_v52  ;;  %v2505_v52 = vld [vmem:[%s3046_s3 + $0x2a0] sm:$0xff] }
  0x35   : > { %774 = vmatpush.bf16.msrb.mxu3 %v2466_v53  ;;  %604 = vmatpush.bf16.msrb.mxu0 %v2439_v54  ;;  %v2513_v53 = vld [vmem:[%s3046_s3 + $0x2e0] sm:$0xff]  ;;  %v2488_v54 = vld [vmem:[%s3046_s3 + $0x218] sm:$0xff] }
  0x36   : > { %617 = vmatpush.bf16.msrb.mxu1 %v2447_v55  ;;  %v2496_v55 = vld [vmem:[%s3046_s3 + $0x258] sm:$0xff] }
  0x38   : > { %762 = vmatpush.bf16.msrb.mxu2 %v2457_v56 }
  0x39   : > { %775 = vmatpush.bf16.msrb.mxu3 %v2465_v57  ;;  %605 = vmatpush.bf16.msrb.mxu0 %v2438_v58  ;;  %v2504_v58 = vld [vmem:[%s3046_s3 + $0x298] sm:$0xff] }
  0x3a   : > { %618 = vmatpush.bf16.msrb.mxu1 %v2446_v59  ;;  %v2512_v59 = vld [vmem:[%s3046_s3 + $0x2d8] sm:$0xff] }
  0x3c   : > { %763 = vmatpush.bf16.msrb.mxu2 %v2456_v60 }
  0x3d   : > { %776 = vmatpush.bf16.msrb.mxu3 %v2464_v61  ;;  %606 = vmatpush.bf16.msrb.mxu0 %v2437_v62  ;;  %v2487_v62 = vld [vmem:[%s3046_s3 + $0x210] sm:$0xff] }
  0x3e   : > { %619 = vmatpush.bf16.msrb.mxu1 %v2445_v63  ;;  %v2495_v63 = vld [vmem:[%s3046_s3 + $0x250] sm:$0xff] }
  0x40   : > { %764 = vmatpush.bf16.msrb.mxu2 %v2455_v10  ;;  %v2501_v10 = vld [vmem:[%s3046_s3 + $0x280] sm:$0xff] }
  0x41   : > { %919 = vmatpush.bf16.msra.mxu0 %v2476_v0  ;;  %777 = vmatpush.bf16.msrb.mxu3 %v2463_v11  ;;  %v2503_v0 = vld [vmem:[%s3046_s3 + $0x290] sm:$0xff]  ;;  %v2509_v11 = vld [vmem:[%s3046_s3 + $0x2c0] sm:$0xff] }
  0x42   : > { %932 = vmatpush.bf16.msra.mxu1 %v2484_v1  ;;  %v2511_v1 = vld [vmem:[%s3046_s3 + $0x2d0] sm:$0xff] }
  0x44   : > { %765 = vmatpush.bf16.msrb.mxu2 %v2454_v14  ;;  %v2523_v14 = vld [vmem:[%s3046_s3 + $0x330] sm:$0xff] }
  0x45   : > { %920 = vmatpush.bf16.msra.mxu0 %v2475_v2  ;;  %778 = vmatpush.bf16.msrb.mxu3 %v2462_v15  ;;  %v2486_v2 = vld [vmem:[%s3046_s3 + $0x208] sm:$0xff]  ;;  %v2531_v15 = vld [vmem:[%s3046_s3 + $0x370] sm:$0xff] }
  0x46   : > { %933 = vmatpush.bf16.msra.mxu1 %v2483_v3  ;;  %v2494_v3 = vld [vmem:[%s3046_s3 + $0x248] sm:$0xff] }
  0x48   : > { %766 = vmatpush.bf16.msrb.mxu2 %v2453_v18  ;;  %v2539_v18 = vld [vmem:[%s3046_s3 + $0x3b0] sm:$0xff] }
  0x49   : > { %921 = vmatpush.bf16.msra.mxu0 %v2474_v4  ;;  %779 = vmatpush.bf16.msrb.mxu3 %v2461_v19  ;;  %v2502_v4 = vld [vmem:[%s3046_s3 + $0x288] sm:$0xff]  ;;  %v2547_v19 = vld [vmem:[%s3046_s3 + $0x3f0] sm:$0xff] }
  0x4a   : > { %934 = vmatpush.bf16.msra.mxu1 %v2482_v5  ;;  %v2510_v5 = vld [vmem:[%s3046_s3 + $0x2c8] sm:$0xff] }
  0x4d   : > { %922 = vmatpush.bf16.msra.mxu0 %v2473_v6  ;;  %v2485_v6 = vld [vmem:[%s3046_s3 + $0x200] sm:$0xff] }
  0x4e   : > { %935 = vmatpush.bf16.msra.mxu1 %v2481_v7  ;;  %v2493_v7 = vld [vmem:[%s3046_s3 + $0x240] sm:$0xff] }
  0x51   : > { %923 = vmatpush.bf16.msra.mxu0 %v2472_v8  ;;  %v2524_v8 = vld [vmem:[%s3046_s3 + $0x338] sm:$0xff] }
  0x52   : > { %936 = vmatpush.bf16.msra.mxu1 %v2480_v9  ;;  %v2532_v9 = vld [vmem:[%s3046_s3 + $0x378] sm:$0xff] }
  0x55   : > { %924 = vmatpush.bf16.msra.mxu0 %v2471_v12  ;;  %v2540_v12 = vld [vmem:[%s3046_s3 + $0x3b8] sm:$0xff] }
  0x56   : > { %937 = vmatpush.bf16.msra.mxu1 %v2479_v13  ;;  %v2548_v13 = vld [vmem:[%s3046_s3 + $0x3f8] sm:$0xff] }
  0x59   : > { %925 = vmatpush.bf16.msra.mxu0 %v2470_v16 }
  0x5a   : > { %938 = vmatpush.bf16.msra.mxu1 %v2478_v17 }
  0x5d   : > { %926 = vmatpush.bf16.msra.mxu0 %v2469_v20 }
  0x5e   : > { %939 = vmatpush.bf16.msra.mxu1 %v2477_v21 }
  0x7f   : > { %v232_v22 = vpop.permute.xlu0 %231 }
  0x9d   : > { %v279_v23 = vpop.f32.mrf.mxu0 }
  0x9e   : > { %v280_v25 = vadd.f32 %v279_v23, %v232_v22  ;;  %v2530_v23 = vld [vmem:[%s3046_s3 + $0x368] sm:$0xff] }
  0xa0   : > { %v292_v24 = vpop.f32.mrf.mxu1  ;;  %v296_v27 = vmax.f32 %v280_v25, 0.0  ;;  %v2546_v25 = vld [vmem:[%s3046_s3 + $0x3e8] sm:$0xff] }
  0xa1   : > { %v293_v26 = vadd.f32 %v292_v24, %v232_v22  ;;  %v2522_v22 = vld [vmem:[%s3046_s3 + $0x328] sm:$0xff] }
  0xa2   : > { %v2538_v24 = vld [vmem:[%s3046_s3 + $0x3a8] sm:$0xff] }
  0xa3   : > { %v297_v28 = vmax.f32 %v293_v26, 0.0  ;;  %v2521_v26 = vld [vmem:[%s3046_s3 + $0x320] sm:$0xff] }
  0xa5   : > { %v298_v29 = vpack.c.bf16 %v297_v28, %v296_v27  ;;  %v281_v32 = vpop.f32.mrf.mxu0  ;;  %v2529_v27 = vld [vmem:[%s3046_s3 + $0x360] sm:$0xff] }
  0xa6   : > { %v2537_v28 = vld [vmem:[%s3046_s3 + $0x3a0] sm:$0xff]  ;;  %v2536_v32 = vld [vmem:[%s3046_s3 + $0x398] sm:$0xff] }
  0xa7   : > { %v333_v30 = vunpack.c.l.b16 %v298_v29  ;;  %v334_v31 = vunpack.c.h.b16 %v298_v29  ;;  %v2545_v29 = vld [vmem:[%s3046_s3 + $0x3e0] sm:$0xff] }
  0xa8   : > { %v294_v33 = vpop.f32.mrf.mxu1 }
  0xa9   : > { %v2821_v36 = vpack.c.b16 %v333_v30, %v333_v30  ;;  %v2823_v37 = vpack.c.b16 %v334_v31, %v334_v31  ;;  %v2520_v30 = vld [vmem:[%s3046_s3 + $0x318] sm:$0xff] }
  0xaa   : > { %v2528_v31 = vld [vmem:[%s3046_s3 + $0x358] sm:$0xff] }
  0xab   : > { %443 = vmatmul.bf16.vlgmr.msra.gmra.mxu2 %v2821_v36  ;;  %456 = vmatmul.bf16.vlgmr.msra.gmra.mxu3 %v2823_v37  ;;  %v2834_v40 = vshrl.u32 %v2821_v36, 16  ;;  %v2837_v41 = vshrl.u32 %v2823_v37, 16  ;;  %v659_v56 = vrot.slane %v2821_v36, 1  ;;  %v660_v57 = vrot.slane %v2823_v37, 1  ;;  %v2544_v33 = vld [vmem:[%s3046_s3 + $0x3d8] sm:$0xff] }
  0xac   : > { %1079 = vmatpush.bf16.msra.mxu2 %v2492_v34  ;;  %1092 = vmatpush.bf16.msra.mxu3 %v2500_v35  ;;  %v979_v16 = vrot.slane %v2821_v36, 2  ;;  %v980_v17 = vrot.slane %v2823_v37, 2  ;;  %v2519_v34 = vld [vmem:[%s3046_s3 + $0x310] sm:$0xff] }
  0xad   : > { %607 = vmatmul.bf16.vlgmr.msrb.gmra.mxu0 %v2834_v40  ;;  %620 = vmatmul.bf16.vlgmr.msrb.gmra.mxu1 %v2837_v41  ;;  %v819_v60 = vrot.slane %v2834_v40, 1  ;;  %v820_v61 = vrot.slane %v2837_v41, 1  ;;  %v1139_v20 = vrot.slane %v2834_v40, 2  ;;  %v1140_v21 = vrot.slane %v2837_v41, 2  ;;  %v2527_v35 = vld [vmem:[%s3046_s3 + $0x350] sm:$0xff] }
  0xae   : > { %1239 = vmatpush.bf16.msrb.mxu0 %v2508_v38  ;;  %1252 = vmatpush.bf16.msrb.mxu1 %v2516_v39  ;;  %v2535_v38 = vld [vmem:[%s3046_s3 + $0x390] sm:$0xff] }
  0xaf   : > { %v2543_v39 = vld [vmem:[%s3046_s3 + $0x3d0] sm:$0xff] }
  0xb0   : > { %1080 = vmatpush.bf16.msra.mxu2 %v2491_v42  ;;  %1093 = vmatpush.bf16.msra.mxu3 %v2499_v43  ;;  %v2518_v42 = vld [vmem:[%s3046_s3 + $0x308] sm:$0xff] }
  0xb1   : > { %v2526_v43 = vld [vmem:[%s3046_s3 + $0x348] sm:$0xff] }
  0xb2   : > { %1240 = vmatpush.bf16.msrb.mxu0 %v2507_v44  ;;  %1253 = vmatpush.bf16.msrb.mxu1 %v2515_v45  ;;  %v2534_v44 = vld [vmem:[%s3046_s3 + $0x388] sm:$0xff] }
  0xb3   : > { %v2542_v45 = vld [vmem:[%s3046_s3 + $0x3c8] sm:$0xff] }
  0xb4   : > { %1081 = vmatpush.bf16.msra.mxu2 %v2490_v46  ;;  %1094 = vmatpush.bf16.msra.mxu3 %v2498_v47  ;;  %v2517_v46 = vld [vmem:[%s3046_s3 + $0x300] sm:$0xff] }
  0xb5   : > { %v2525_v47 = vld [vmem:[%s3046_s3 + $0x340] sm:$0xff] }
  0xb6   : > { %1241 = vmatpush.bf16.msrb.mxu0 %v2506_v48  ;;  %1254 = vmatpush.bf16.msrb.mxu1 %v2514_v49  ;;  %v2533_v48 = vld [vmem:[%s3046_s3 + $0x380] sm:$0xff] }
  0xb7   : > { %v2541_v49 = vld [vmem:[%s3046_s3 + $0x3c0] sm:$0xff] }
  0xb8   : > { %1082 = vmatpush.bf16.msra.mxu2 %v2489_v50  ;;  %1095 = vmatpush.bf16.msra.mxu3 %v2497_v51  ;;  %v1299_v50 = vrot.slane %v2821_v36, 3  ;;  %v1300_v51 = vrot.slane %v2823_v37, 3 }
  0xba   : > { %1242 = vmatpush.bf16.msrb.mxu0 %v2505_v52  ;;  %1255 = vmatpush.bf16.msrb.mxu1 %v2513_v53  ;;  %v1459_v52 = vrot.slane %v2834_v40, 3  ;;  %v1460_v53 = vrot.slane %v2837_v41, 3 }
  0xbb   : > { %767 = vmatmul.bf16.vlgmr.msrb.gmra.mxu2 %v659_v56  ;;  %780 = vmatmul.bf16.vlgmr.msrb.gmra.mxu3 %v660_v57 }
  0xbc   : > { %1083 = vmatpush.bf16.msra.mxu2 %v2488_v54  ;;  %1096 = vmatpush.bf16.msra.mxu3 %v2496_v55 }
  0xbd   : > { %927 = vmatmul.bf16.vlgmr.msra.gmra.mxu0 %v819_v60  ;;  %940 = vmatmul.bf16.vlgmr.msra.gmra.mxu1 %v820_v61 }
  0xbe   : > { %1243 = vmatpush.bf16.msrb.mxu0 %v2504_v58  ;;  %1256 = vmatpush.bf16.msrb.mxu1 %v2512_v59 }
  0xc0   : > { %1084 = vmatpush.bf16.msra.mxu2 %v2487_v62  ;;  %1097 = vmatpush.bf16.msra.mxu3 %v2495_v63 }
  0xc2   : > { %1244 = vmatpush.bf16.msrb.mxu0 %v2503_v0  ;;  %1257 = vmatpush.bf16.msrb.mxu1 %v2511_v1 }
  0xc4   : > { %1085 = vmatpush.bf16.msra.mxu2 %v2486_v2  ;;  %1098 = vmatpush.bf16.msra.mxu3 %v2494_v3 }
  0xc6   : > { %1245 = vmatpush.bf16.msrb.mxu0 %v2502_v4  ;;  %1258 = vmatpush.bf16.msrb.mxu1 %v2510_v5 }
  0xc8   : > { %1086 = vmatpush.bf16.msra.mxu2 %v2485_v6  ;;  %1099 = vmatpush.bf16.msra.mxu3 %v2493_v7 }
  0xca   : > { %1246 = vmatpush.bf16.msrb.mxu0 %v2501_v10  ;;  %1259 = vmatpush.bf16.msrb.mxu1 %v2509_v11  ;;  %v299_v11 = vld [vmem:[%s3047_s4] sm:$0x1] }
  0xcb   : > { %1087 = vmatmul.bf16.vlgmr.msra.gmra.mxu2 %v979_v16  ;;  %1100 = vmatmul.bf16.vlgmr.msra.gmra.mxu3 %v980_v17 }
  0xcc   : > { %1399 = vmatpush.bf16.msrb.mxu2 %v2524_v8  ;;  %1412 = vmatpush.bf16.msrb.mxu3 %v2532_v9 }
  0xcd   : > { %1247 = vmatmul.bf16.vlgmr.msrb.gmra.mxu0 %v1139_v20  ;;  %1260 = vmatmul.bf16.vlgmr.msrb.gmra.mxu1 %v1140_v21 }
  0xce   : > { %1559 = vmatpush.bf16.msra.mxu0 %v2540_v12  ;;  %1572 = vmatpush.bf16.msra.mxu1 %v2548_v13 }
  0xd0   : > { %1400 = vmatpush.bf16.msrb.mxu2 %v2523_v14  ;;  %1413 = vmatpush.bf16.msrb.mxu3 %v2531_v15 }
  0xd2   : > { %1560 = vmatpush.bf16.msra.mxu0 %v2539_v18  ;;  %1573 = vmatpush.bf16.msra.mxu1 %v2547_v19 }
  0xd4   : > { %1401 = vmatpush.bf16.msrb.mxu2 %v2522_v22  ;;  %1414 = vmatpush.bf16.msrb.mxu3 %v2530_v23 }
  0xd6   : > { %1561 = vmatpush.bf16.msra.mxu0 %v2538_v24  ;;  %1574 = vmatpush.bf16.msra.mxu1 %v2546_v25 }
  0xd8   : > { %1402 = vmatpush.bf16.msrb.mxu2 %v2521_v26  ;;  %1415 = vmatpush.bf16.msrb.mxu3 %v2529_v27 }
  0xda   : > { %1562 = vmatpush.bf16.msra.mxu0 %v2537_v28  ;;  %1575 = vmatpush.bf16.msra.mxu1 %v2545_v29 }
  0xdc   : > { %1403 = vmatpush.bf16.msrb.mxu2 %v2520_v30  ;;  %1416 = vmatpush.bf16.msrb.mxu3 %v2528_v31 }
  0xde   : > { %1563 = vmatpush.bf16.msra.mxu0 %v2536_v32  ;;  %1576 = vmatpush.bf16.msra.mxu1 %v2544_v33 }
  0xe0   : > { %1404 = vmatpush.bf16.msrb.mxu2 %v2519_v34  ;;  %1417 = vmatpush.bf16.msrb.mxu3 %v2527_v35 }
  0xe2   : > { %1564 = vmatpush.bf16.msra.mxu0 %v2535_v38  ;;  %1577 = vmatpush.bf16.msra.mxu1 %v2543_v39 }
  0xe4   : > { %1405 = vmatpush.bf16.msrb.mxu2 %v2518_v42  ;;  %1418 = vmatpush.bf16.msrb.mxu3 %v2526_v43 }
  0xe6   : > { %1565 = vmatpush.bf16.msra.mxu0 %v2534_v44  ;;  %1578 = vmatpush.bf16.msra.mxu1 %v2542_v45 }
  0xe8   : > { %1406 = vmatpush.bf16.msrb.mxu2 %v2517_v46  ;;  %1419 = vmatpush.bf16.msrb.mxu3 %v2525_v47 }
  0xea   : > { %1566 = vmatpush.bf16.msra.mxu0 %v2533_v48  ;;  %1579 = vmatpush.bf16.msra.mxu1 %v2541_v49 }
  0xeb   : > { %1407 = vmatmul.bf16.vlgmr.msrb.gmra.mxu2 %v1299_v50  ;;  %1420 = vmatmul.bf16.vlgmr.msrb.gmra.mxu3 %v1300_v51 }
  0xed   : > { %1567 = vmatmul.bf16.vlgmr.msra.gmra.mxu0 %v1459_v52  ;;  %1580 = vmatmul.bf16.vlgmr.msra.gmra.mxu1 %v1460_v53 }
 0x12a   : > { %v608_v54 = vpop.f32.mrf.mxu0  ;;  %v621_v55 = vpop.f32.mrf.mxu1 }
 0x12b   : > { %v622_v13 = vadd.f32 %v621_v55, %v608_v54 }
 0x12e   : > { %v444_v56 = vpop.f32.mrf.mxu2  ;;  %v457_v57 = vpop.f32.mrf.mxu3 }
 0x12f   : > { %v458_v10 = vadd.f32 %v457_v57, %v444_v56 }
 0x131   : > { %v461_v12 = vadd.f32 %v458_v10, %v299_v11 }
 0x132   : > { %v610_v58 = vpop.f32.mrf.mxu0  ;;  %v623_v59 = vpop.f32.mrf.mxu1 }
 0x133   : > { %v625_v15 = vadd.f32 %v622_v13, %v461_v12 }
 0x136   : > { %v446_v60 = vpop.f32.mrf.mxu2  ;;  %v459_v36 = vpop.f32.mrf.mxu3 }
 0x13a   : > { %v928_v61 = vpop.f32.mrf.mxu0  ;;  %v941_v37 = vpop.f32.mrf.mxu1 }
 0x13b   : > { %v942_v17 = vadd.f32 %v941_v37, %v928_v61 }
 0x13e   : > { %v768_v62 = vpop.f32.mrf.mxu2  ;;  %v781_v63 = vpop.f32.mrf.mxu3 }
 0x13f   : > { %v782_v14 = vadd.f32 %v781_v63, %v768_v62 }
 0x141   : > { %v785_v16 = vadd.f32 %v782_v14, %v625_v15 }
 0x142   : > { %v930_v0 = vpop.f32.mrf.mxu0  ;;  %v943_v1 = vpop.f32.mrf.mxu1 }
 0x143   : > { %v945_v19 = vadd.f32 %v942_v17, %v785_v16 }
 0x146   : > { %v770_v2 = vpop.f32.mrf.mxu2  ;;  %v783_v40 = vpop.f32.mrf.mxu3 }
 0x14a   : > { %v1248_v3 = vpop.f32.mrf.mxu0  ;;  %v1261_v41 = vpop.f32.mrf.mxu1 }
 0x14b   : > { %v1262_v23 = vadd.f32 %v1261_v41, %v1248_v3 }
 0x14e   : > { %v1088_v4 = vpop.f32.mrf.mxu2  ;;  %v1101_v5 = vpop.f32.mrf.mxu3 }
 0x14f   : > { %v1102_v18 = vadd.f32 %v1101_v5, %v1088_v4 }
 0x151   : > { %v1105_v22 = vadd.f32 %v1102_v18, %v945_v19 }
 0x152   : > { %v1250_v6 = vpop.f32.mrf.mxu0  ;;  %v1263_v7 = vpop.f32.mrf.mxu1 }
 0x153   : > { %v1265_v26 = vadd.f32 %v1262_v23, %v1105_v22 }
 0x156   : > { %v1090_v8 = vpop.f32.mrf.mxu2  ;;  %v1103_v9 = vpop.f32.mrf.mxu3 }
 0x16a   : > { %v1568_v20 = vpop.f32.mrf.mxu0  ;;  %v1581_v21 = vpop.f32.mrf.mxu1 }
 0x16b   : > { %v1582_v28 = vadd.f32 %v1581_v21, %v1568_v20 }
 0x16e   : > { %v1408_v24 = vpop.f32.mrf.mxu2  ;;  %v1421_v25 = vpop.f32.mrf.mxu3 }
 0x16f   : > { %v1422_v27 = vadd.f32 %v1421_v25, %v1408_v24 }
 0x171   : > { %v1425_v29 = vadd.f32 %v1422_v27, %v1265_v26 }
 0x172   : > { %v1570_v30 = vpop.f32.mrf.mxu0  ;;  %v1583_v31 = vpop.f32.mrf.mxu1 }
 0x173   : > { %v1585_v32 = vadd.f32 %v1582_v28, %v1425_v29 }
 0x175   : > { %v2414_v33 = vmul.f32 -1.442695, %v1585_v32 }
 0x176   : > { %v1410_v34 = vpop.f32.mrf.mxu2  ;;  %v1423_v35 = vpop.f32.mrf.mxu3 }
 0x177   : > { %2560 = vpow2.f32 %v2414_v33 }
 0x17d   : > { %v2561_v38 = vpop.eup %2560 }
 0x17e   : > { %v1589_v39 = vadd.f32 1.0, %v2561_v38 }
 0x180   : > { %2562 = vrcp.f32 %v1589_v39  ;;  %v1601_v45 = vand.u32 2147483648, %v1589_v39  ;;  %v1599_v47 = vand.u32 2147483647, %v1589_v39  ;;  %vm1595_vm3 = vweird.f32 %v1589_v39 }
 0x182   : > { %v1602_v49 = vor.u32 1.1754944e-38, %v1601_v45  ;;  %vm1600_vm6 = vcmp.eq.f32.partialorder %v1599_v47, 8.507059e+37 }
 0x186   : > { %v2563_v42 = vpop.eup %2562 }
 0x187   : > { %v1591_v43 = vmul.f32 %v2563_v42, %v1589_v39  ;;  %vm1596_vm2 = vweird.f32 %v2563_v42 }
 0x188   : > { %vm1597_vm4 = vmor %vm1595_vm3, %vm1596_vm2 }
 0x189   : > { %v1592_v44 = vsub.f32 1.0, %v1591_v43 }
 0x18b   : > { %v1593_v46 = vmul.f32 %v2563_v42, %v1592_v44 }
 0x18d   : > { %v1594_v48 = vadd.f32 %v2563_v42, %v1593_v46 }
 0x18f   : > { %v1598_v50 = vsel %vm1597_vm4, %v2563_v42, %v1594_v48 }
 0x190   : > { %v1603_v51 = vsel %vm1600_vm6, %v1602_v49, %v1598_v50 }
 0x191   : > { %1606 = vst.msk [vmem:[%s220_s10] sm:$0x1] %vm1605_vm5, %v1603_v51 }
 0x192 PF: > { %s15_s18 = sadd.s32 1, %s2570_s18  }
 0x193   : > { %p12_p4 = scmp.ge.s32.totalorder %s15_s18, 6  }
 0x195   :  { %14 = sbr.rel (!%p12_p4) target bundleno = 1 (0x1), region = 77 }

</bundles_post_ra>
